<compile_context>
chip_gen: v5e
topology: v5e:2x2
jax: 0.10.0
libtpu: 0.0.40
codegen_flags: <defaults>
</compile_context>

<pallas_src>
import functools

import jax
import jax.numpy as jnp
from jax import lax
from jax.experimental import pallas as pl
from jax.experimental.pallas import tpu as pltpu


def _layer_norm_3d_kernel(x_ref, w_ref, b_ref, o_ref, *, eps):
    # x_ref / o_ref: (1, C, TN) VMEM tiles; w_ref / b_ref: (1, C, 1).
    x = x_ref[...].astype(jnp.float32)
    # Single pass over x for both moments (channel reduce = XLU sublane reduce).
    u = jnp.mean(x, axis=1, keepdims=True)              # (1, 1, TN)  E[x]
    ex2 = jnp.mean(x * x, axis=1, keepdims=True)        # (1, 1, TN)  E[x^2]
    var = jnp.maximum(ex2 - u * u, 0.0)                 # clamp cancellation noise
    inv = lax.rsqrt(var + eps)                          # EUP rsqrt (free slot)
    w = w_ref[...].astype(jnp.float32)                  # (1, C, 1)
    b = b_ref[...].astype(jnp.float32)
    g = w * inv                                         # (1, C, TN) fused scale
    o_ref[...] = ((x - u) * g + b).astype(o_ref.dtype)


def _choose_tile_n(n, c, dtype_bytes, batch, *,
                   max_block_bytes=6 * 1024 * 1024, min_steps=4):
    """Pick lane-tile width TN (multiple of 128) for the flattened spatial axis."""
    # Sublane packing: 8 sublanes/vreg for 32-bit, 16 for 16-bit, 32 for 8-bit.
    pack = max(8, 32 // max(dtype_bytes, 1))
    padded_c = ((c + pack - 1) // pack) * pack           # VMEM footprint uses padded C
    bytes_per_lane = max(padded_c * dtype_bytes, 1)
    max_lanes = max(128, ((max_block_bytes // bytes_per_lane) // 128) * 128)
    n_pad = ((n + 127) // 128) * 128                     # round up: edge block is partial
    tn = min(max_lanes, n_pad)
    # Keep a few grid steps alive for megacore sharding / pipeline warm-up.
    while (batch * pl.cdiv(n, tn) < min_steps and tn > 512
           and (tn // 2) % 128 == 0):
        tn //= 2
    return tn


def layer_norm_3d(x, weight, bias, *, eps=1e-6):
    """x: (B, C, W, H, D); weight, bias: (C,).  Returns (B, C, W, H, D)."""
    B, C, W, H, D = x.shape
    assert weight.shape == (C,) and bias.shape == (C,)
    N = W * H * D
    dtype_bytes = jnp.dtype(x.dtype).itemsize

    # Lane-dense layout: last dim is the full flattened spatial axis.
    x2 = x.reshape(B, C, N)
    w2 = weight.reshape(1, C, 1)
    b2 = bias.reshape(1, C, 1)

    tn = _choose_tile_n(N, C, dtype_bytes, B)
    n_tiles = pl.cdiv(N, tn)                     # partial edge block is allowed

    kernel = functools.partial(_layer_norm_3d_kernel, eps=float(eps))

    cost = pl.CostEstimate(
        flops=7 * B * C * N,
        transcendentals=B * N,
        bytes_accessed=2 * B * C * N * dtype_bytes + 2 * C * dtype_bytes,
    )

    out = pl.pallas_call(
        kernel,
        out_shape=jax.ShapeDtypeStruct((B, C, N), x.dtype),
        grid_spec=pltpu.PrefetchScalarGridSpec(
            num_scalar_prefetch=0,
            grid=(B, n_tiles),                   # batch OUTER, spatial tile INNER
            in_specs=[
                pl.BlockSpec((1, C, tn), lambda b, t: (b, 0, t)),
                pl.BlockSpec((1, C, 1), lambda b, t: (0, 0, 0)),   # weight: one DMA
                pl.BlockSpec((1, C, 1), lambda b, t: (0, 0, 0)),   # bias:   one DMA
            ],
            out_specs=pl.BlockSpec((1, C, tn), lambda b, t: (b, 0, t)),
        ),
        compiler_params=pltpu.CompilerParams(
            dimension_semantics=("parallel", "parallel"),
            vmem_limit_bytes=48 * 1024 * 1024,
        ),
        cost_estimate=cost,
    )(x2, w2, b2)

    return out.reshape(B, C, W, H, D)


def _layer_norm_3d_ref(x, weight, bias, eps=1e-6):
    u = jnp.mean(x, axis=1, keepdims=True)
    s = jnp.mean((x - u) ** 2, axis=1, keepdims=True)
    xn = (x - u) / jnp.sqrt(s + eps)
    return (weight[None, :, None, None, None] * xn
            + bias[None, :, None, None, None])


if __name__ == "__main__":
    # Small shapes consistent with the module: num_channels=4, batch=2,
    # spatial (W, H, D) = (8, 8, 16).
    B, C, W, H, D = 2, 4, 8, 8, 16
    eps = 1e-6

    key = jax.random.PRNGKey(0)
    kx, kw, kb = jax.random.split(key, 3)

    x = jax.random.normal(kx, (B, C, W, H, D), dtype=jnp.float32)
    # Module init is weight=ones / bias=zeros; perturb so the affine path is tested.
    weight = jnp.ones((C,), jnp.float32) + 0.1 * jax.random.normal(kw, (C,), jnp.float32)
    bias = 0.1 * jax.random.normal(kb, (C,), jnp.float32)

    out = layer_norm_3d(x, weight, bias, eps=eps)
    out = jax.block_until_ready(out)

    ref = _layer_norm_3d_ref(x, weight, bias, eps=eps)
    assert out.shape == (B, C, W, H, D)
    assert jnp.allclose(out, ref, atol=1e-5, rtol=1e-5), float(
        jnp.max(jnp.abs(out - ref)))

    print("KERNEL_OK")
</pallas_src>

<mosaic_0001>
module attributes {stable_mosaic.version = 11 : i64} {
  func.func @_layer_norm_3d_kernel(%arg0: i32, %arg1: i32, %arg2: memref<1x4x512xf32, #tpu.memory_space<vmem>>, %arg3: memref<1x4x1xf32, #tpu.memory_space<vmem>>, %arg4: memref<1x4x1xf32, #tpu.memory_space<vmem>>, %arg5: memref<1x4x512xf32, #tpu.memory_space<vmem>>) attributes {dimension_semantics = [#tpu.dimension_semantics<parallel>, #tpu.dimension_semantics<parallel>], iteration_bounds = array<i64: 2, 2>, scalar_prefetch = 0 : i64, scratch_operands = 0 : i64, tpu.core_type = #tpu.core_type<tc>, window_params = [{transform_indices = @transform_0, window_bounds = array<i64: 1, 4, 512>}, {pipeline_mode = #tpu.pipeline_mode<synchronous>, transform_indices = @transform_1, window_bounds = array<i64: 1, 4, 1>}, {pipeline_mode = #tpu.pipeline_mode<synchronous>, transform_indices = @transform_2, window_bounds = array<i64: 1, 4, 1>}, {transform_indices = @transform_3, window_bounds = array<i64: 1, 4, 512>}]} {
    %c0 = arith.constant 0 : index
    %c0_0 = arith.constant 0 : index
    %c0_1 = arith.constant 0 : index
    %0 = vector.load %arg2[%c0, %c0_0, %c0_1] : memref<1x4x512xf32, #tpu.memory_space<vmem>>, vector<1x4x512xf32>
    %cst = arith.constant dense<0.000000e+00> : vector<1x512xf32>
    %1 = vector.multi_reduction <add>, %0, %cst [1] : vector<1x4x512xf32> to vector<1x512xf32>
    %2 = vector.shape_cast %1 : vector<1x512xf32> to vector<1x1x512xf32>
    %cst_2 = arith.constant 4.000000e+00 : f32
    %3 = vector.broadcast %cst_2 : f32 to vector<1x1x512xf32>
    %4 = arith.divf %2, %3 : vector<1x1x512xf32>
    %5 = arith.mulf %0, %0 : vector<1x4x512xf32>
    %cst_3 = arith.constant dense<0.000000e+00> : vector<1x512xf32>
    %6 = vector.multi_reduction <add>, %5, %cst_3 [1] : vector<1x4x512xf32> to vector<1x512xf32>
    %7 = vector.shape_cast %6 : vector<1x512xf32> to vector<1x1x512xf32>
    %cst_4 = arith.constant 4.000000e+00 : f32
    %8 = vector.broadcast %cst_4 : f32 to vector<1x1x512xf32>
    %9 = arith.divf %7, %8 : vector<1x1x512xf32>
    %10 = arith.mulf %4, %4 : vector<1x1x512xf32>
    %11 = arith.subf %9, %10 : vector<1x1x512xf32>
    %cst_5 = arith.constant 0.000000e+00 : f32
    %12 = vector.broadcast %cst_5 : f32 to vector<1x1x512xf32>
    %13 = arith.maximumf %11, %12 : vector<1x1x512xf32>
    %cst_6 = arith.constant 9.99999997E-7 : f32
    %14 = vector.broadcast %cst_6 : f32 to vector<1x1x512xf32>
    %15 = arith.addf %13, %14 : vector<1x1x512xf32>
    %16 = math.rsqrt %15 : vector<1x1x512xf32>
    %c0_7 = arith.constant 0 : index
    %c0_8 = arith.constant 0 : index
    %c0_9 = arith.constant 0 : index
    %17 = vector.load %arg3[%c0_7, %c0_8, %c0_9] : memref<1x4x1xf32, #tpu.memory_space<vmem>>, vector<1x4x1xf32>
    %c0_10 = arith.constant 0 : index
    %c0_11 = arith.constant 0 : index
    %c0_12 = arith.constant 0 : index
    %18 = vector.load %arg4[%c0_10, %c0_11, %c0_12] : memref<1x4x1xf32, #tpu.memory_space<vmem>>, vector<1x4x1xf32>
    %19 = vector.broadcast %17 : vector<1x4x1xf32> to vector<1x4x512xf32>
    %20 = vector.broadcast %16 : vector<1x1x512xf32> to vector<1x4x512xf32>
    %21 = arith.mulf %19, %20 : vector<1x4x512xf32>
    %22 = vector.broadcast %4 : vector<1x1x512xf32> to vector<1x4x512xf32>
    %23 = arith.subf %0, %22 : vector<1x4x512xf32>
    %24 = arith.mulf %23, %21 : vector<1x4x512xf32>
    %25 = vector.broadcast %18 : vector<1x4x1xf32> to vector<1x4x512xf32>
    %26 = arith.addf %24, %25 : vector<1x4x512xf32>
    %c0_13 = arith.constant 0 : index
    %c0_14 = arith.constant 0 : index
    %c0_15 = arith.constant 0 : index
    %27 = vector.load %arg5[%c0_13, %c0_14, %c0_15] : memref<1x4x512xf32, #tpu.memory_space<vmem>>, vector<1x4x512xf32>
    tpu.vector_store %arg5[%c0_13, %c0_14, %c0_15], %26 {strides = array<i32>} : memref<1x4x512xf32, #tpu.memory_space<vmem>>, vector<1x4x512xf32>,
    return
  }
  func.func @transform_0(%arg0: i32, %arg1: i32) -> (i32, i32, i32) {
    %c0_i32 = arith.constant 0 : i32
    %c0_i32_0 = arith.constant 0 : i32
    return %arg0, %c0_i32, %arg1 : i32, i32, i32
  }
  func.func @transform_1(%arg0: i32, %arg1: i32) -> (i32, i32, i32) {
    %c0_i32 = arith.constant 0 : i32
    %c0_i32_0 = arith.constant 0 : i32
    %c0_i32_1 = arith.constant 0 : i32
    %c0_i32_2 = arith.constant 0 : i32
    return %c0_i32, %c0_i32_0, %c0_i32_1 : i32, i32, i32
  }
  func.func @transform_2(%arg0: i32, %arg1: i32) -> (i32, i32, i32) {
    %c0_i32 = arith.constant 0 : i32
    %c0_i32_0 = arith.constant 0 : i32
    %c0_i32_1 = arith.constant 0 : i32
    %c0_i32_2 = arith.constant 0 : i32
    return %c0_i32, %c0_i32_0, %c0_i32_1 : i32, i32, i32
  }
  func.func @transform_3(%arg0: i32, %arg1: i32) -> (i32, i32, i32) {
    %c0_i32 = arith.constant 0 : i32
    %c0_i32_0 = arith.constant 0 : i32
    return %arg0, %c0_i32, %arg1 : i32, i32, i32
  }
}

</mosaic_0001>

<bundles_post_ra>
// kernel: tpu_custom_call.1
= control target key start
LH: loop header
LB: loop body
LE: loop exit
PB: predicated region body
PF: predicated region fallthrough
CT: control target
= control target key end

     0   :  { %8 = vsyncpa [#allocation3], 0  ;;  %s1003_s0 = inlined_call_operand.hbm [shape: f32[2,4,1024], index: 0, kind: input, shape index: {}]   ;;  %s1004_s1 = inlined_call_operand.vmem [shape: f32[1,4,1], index: 1, kind: input, shape index: {}]   ;;  %s1005_s2 = inlined_call_operand.vmem [shape: f32[1,4,1], index: 2, kind: input, shape index: {}]   ;;  %s1006_s3 = inlined_call_operand.hbm [shape: f32[2,4,1024], index: 3, kind: output, shape index: {}]  }
   0x1   :  { %10 = vsyncpa [#allocation3 + $0x1], 0 }
   0x2   :  { %11 = vsyncpa [#allocation4], 0 }
   0x3   :  { %13 = vsyncpa [#allocation4 + $0x1], 0  ;;  %s783_s12 = smov 0   ;;  %s785_s13 = smov 0  }
   0x4   :  { %s787_s14 = smov 0   ;;  %s789_s15 = smov 0  }
   0x5   :  { %s791_s16 = smov 0   ;;  %s793_s17 = smov 0  }
   0x6   :  { %s795_s18 = smov 0   ;;  %s797_s19 = smov 0  }
   0x7 LB: > { %s521_s20 = sadd.s32 4294967295, %s758_s19   ;;  %s522_s21 = sadd.s32 4294967294, %s758_s19   ;;  %s758_s19 = sphi %s797_s19, %s19_s19   ;;  %s754_s18 = sphi %s795_s18, %s1028_s18   ;;  %s750_s17 = sphi %s793_s17, %s1027_s17   ;;  %s746_s16 = sphi %s791_s16, %s1026_s16   ;;  %s742_s15 = sphi %s789_s15, %s1025_s15   ;;  %s738_s14 = sphi %s787_s14, %s1024_s14   ;;  %s734_s13 = sphi %s785_s13, %s1023_s13   ;;  %s730_s12 = sphi %s783_s12, %s1022_s12  }
   0x8   : > { %s28_s22 = sadd.s32 1, %s750_s17  ;;  %s31_s23 = sadd.s32 1, %s754_s18 }
   0x9   : > { %p29_p0 = scmp.ge.s32.totalorder %s28_s22, 2  ;;  %s40_s24 = sadd.s32 1, %s738_s14 }
   0xa   : > { %p47_p1 = scmp.ne.s32.totalorder %s738_s14, %s734_s13  ;;  %p48_p2 = scmp.eq.s32.totalorder %s758_s19, 0 }
   0xb   : > { %s1030_s22 = smov (%p29_p0, %s28_s22), 0  ;;  %s1032_s23 = smov (!%p29_p0, %s31_s23), %s754_s18 }
   0xc   : > { %s36_s25 = ssub.s32 %s750_s17, %s1030_s22  ;;  %p836_p3 = por %p48_p2, %p47_p1 }
   0xd   : > { %p33_p4 = scmp.ge.s32.totalorder %s1032_s23, 2  ;;  %p53_p5 = scmp.ne.s32.totalorder %s734_s13, %s730_s12 }
   0xe   : > { %p54_p6 = scmp.eq.s32.totalorder %s521_s20, 0  ;;  %p121_p7 = scmp.eq.s32.totalorder %s521_s20, 3 }
   0xf   : > { %s1034_s23 = smov (%p33_p4, %s1032_s23), 0  ;;  %p127_p10 = scmp.eq.s32.totalorder %s522_s21, 3 }
  0x10   : > { %1009 = sst [smem:[#allocation8_spill]] %s1034_s23  ;;  %p844_p8 = por %p54_p6, %p53_p5 }
  0x11   : > { %p848_p9 = por %p121_p7, %p47_p1  ;;  %s35_s29 = ssub.s32 %s754_s18, %s1034_s23 }
  0x12   : > { %s37_s30 = sor.u32 %s36_s25, %s35_s29  ;;  %p854_p12 = por %p127_p10, %p53_p5 }
  0x13   : > { %p38_p11 = scmp.eq.s32.totalorder %s37_s30, 0  ;;  %p550_p13 = scmp.lt.s32.totalorder %s758_s19, 4 }
  0x14   : > { %s153_s5 = sand.u32 1, %s738_s14   ;;  %s526_s8 = sshll.u32 %s750_s17, 2 }
  0x15   : > { %s861_s6 = scalar_select %p38_p11, %s738_s14, %s40_s24  }
  0x16   : > { %s525_s7 = sshll.u32 %s153_s5, 4  ;;  %s527_s9 = sshll.u32 %s754_s18, 3 }
  0x17   : > { %s157_s10 = scalar_lea.vmem [#allocation2], %s525_s7  ;;  %s162_s20 = sadd.s32 %s527_s9, %s526_s8 }
  0x18   : > { %s168_s11 = sshll.u32 %s157_s10, 4  ;;  %s528_s21 = sshll.u32 %s162_s20, 2  ;;  %s169_s11 = int_to_ptr.vmem [resolvable:$true] %s168_s11 }
  0x19   : > { %p543_p0 = pnand %p550_p13, %p836_p3  ;;  %s164_s30 = scalar_lea.hbm %s1003_s0, %s528_s21 }
  0x1a   : > { %p529_p1 = scmp.ge.s32.totalorder %s758_s19, 1  ;;  %s166_s23 = sshll.u32 %s164_s30, 4  ;;  %s167_s23 = int_to_ptr.hbm [resolvable:$true] %s166_s23 }
  0x1b   : > { %p173_p2 = scmp.lt.s32.totalorder %s758_s19, 5  ;;  %s154_s24 = scalar_lea.sflag [#allocation3], %s153_s5 }
  0x1c   : > { %545 = dma.hbm_to_vmem [thread:$0]  (!%p543_p0), %s167_s23, 256, %s169_s11, %s154_s24  }
  0x1d   : > { %p174_p4 = pnand %p529_p1, %p173_p2 }
  0x1e   : > { %s873_s7 = sand.u32 (!%p174_p4), 1, %s734_s13  }
  0x1f   : > { %177 = sbr.rel (%p174_p4) target bundleno = 170 (0xaa), region = 32  ;;  %s530_s26 = sshll.u32 (!%p174_p4), %s873_s7, 4 }
  0x20   : > { %s180_s8 = scalar_lea.sflag (!%p174_p4), [#allocation3], %s873_s7  ;;  %s183_s9 = scalar_lea.vmem (!%p174_p4), [#allocation2], %s530_s26 }
  0x24   : > { %721 = dma.done.wait (%p844_p8), %s180_s8, 256  }
  0x25   : > { %723 = vsyncadd (%p844_p8), %s180_s8, 4294967040  ;;  %v760_v0 = vmov 0   ;;  %v367_v1 = vld [vmem:[%s1004_s1] sm:$0xf]  ;;  %v889_v3 = vld [vmem:[%s183_s9] sm:$0xff]  ;;  %v761_v5 = vmov 4.0  }
  0x26   : > { %619 = vset.pattern.permute.xlu0 %v760_v0  ;;  %v368_v2 = vld [vmem:[%s1005_s2] sm:$0xf]  ;;  %213 = vst [vmem:[#allocation1] ss:$2 sm:$0xff] %v889_v3  ;;  %620 = vrcp.f32 %v761_v5  ;;  %v264_v6 = vmul.f32 %v889_v3, %v889_v3  ;;  %vm224_vm0 = vcmask 1043456   ;;  %s533_s27 = sshll.u32 %s742_s15, 2 }
  0x27   : > { %371 = vperm.xlu0 %619, %v367_v1   ;;  %v891_v4 = vld [vmem:[%s183_s9 + $0x8] sm:$0xff]  ;;  %s534_s20 = sshll.u32 %s746_s16, 3  ;;  %s206_s30 = scalar_lea.vmem [#allocation5], %s530_s26 }
  0x28   : > { %215 = vst [vmem:[#allocation1 + $0x10] ss:$2 sm:$0xff] %v891_v4  ;;  %v265_v7 = vmul.f32 %v891_v4, %v891_v4  ;;  %s427_s21 = sadd.s32 %s534_s20, %s533_s27  ;;  %s431_s24 = sshll.u32 %s206_s30, 4  ;;  %s432_s24 = int_to_ptr.vmem [resolvable:$true] %s431_s24 }
  0x29   : > { %s535_s15 = sshll.u32 %s427_s21, 2  ;;  %s416_s9 = scalar_lea.sflag [#allocation4], %s873_s7 }
  0x2a   : > { %s429_s29 = scalar_lea.hbm %s1006_s3, %s535_s15  ;;  %s680_s26 = scalar_lea.hbm %s1006_s3, 64 }
  0x2b   : > { %s433_s8 = sshll.u32 %s429_s29, 4  ;;  %s434_s8 = int_to_ptr.hbm [resolvable:$true] %s433_s8 }
  0x2c   : > { %v621_v12 = vpop.eup %620  ;;  %s674_s23 = sshra.s32 %s434_s8, 4  ;;  %s675_s23 = int_to_ptr.hbm [resolvable:$true] %s674_s23 }
  0x2d   : > { %v216_v8 = vld.sshfl [vmem:[#allocation1] sm:$0xff pattern:$0x75316420]  ;;  %v217_v9 = vld.sshfl [vmem:[#allocation1 + $0x8] sm:$0xff pattern:$0x75316420]  ;;  %vm258_vm1 = vweird.f32 %v621_v12  ;;  %p681_p7 = scmp.lt.s32.totalorder %s675_s23, %s1006_s3 }
  0x2e   : > { %268 = vst [vmem:[#allocation1] ss:$2 sm:$0xff] %v264_v6  ;;  %v254_v13 = vmul.f32 4.0, %v621_v12  ;;  %v225_v14 = vsel %vm224_vm0, %v216_v8, 0.0  ;;  %v232_v15 = vsel %vm224_vm0, %v217_v9, 0.0  ;;  %s676_s5 = scalar_lea.hbm %s675_s23, 16 }
  0x2f   : > { %404 = vperm.xlu0 %619, %v368_v2   ;;  %v218_v10 = vld.sshfl [vmem:[#allocation1 + $0x10] sm:$0xff pattern:$0x75316420]  ;;  %v219_v11 = vld.sshfl [vmem:[#allocation1 + $0x18] sm:$0xff pattern:$0x75316420]  ;;  %p677_p3 = scmp.ne.s32.totalorder %s675_s23, %s676_s5  ;;  %p682_p8 = scmp.lt.s32.totalorder %s680_s26, %s676_s5 }
  0x30   : > { %270 = vst [vmem:[#allocation1 + $0x10] ss:$2 sm:$0xff] %v265_v7  ;;  %v239_v16 = vsel %vm224_vm0, %v218_v10, 0.0  ;;  %v246_v17 = vsel %vm224_vm0, %v219_v11, 0.0  ;;  %v226_v18 = vrot.slane %v225_v14, 4  ;;  %v233_v19 = vrot.slane %v232_v15, 4 }
  0x31   : > { %v240_v20 = vrot.slane %v239_v16, 4  ;;  %v247_v21 = vrot.slane %v246_v17, 4  ;;  %v255_v34 = vsub.f32 1.0, %v254_v13  ;;  %p678_p5 = pnand %p677_p3, %p848_p9  ;;  %p683_p10 = por %p682_p8, %p681_p7 }
  0x32   : > { %v227_v24 = vadd.f32 %v226_v18, %v225_v14  ;;  %v234_v25 = vadd.f32 %v233_v19, %v232_v15 }
  0x33   : > { %v241_v26 = vadd.f32 %v240_v20, %v239_v16  ;;  %v248_v27 = vadd.f32 %v247_v21, %v246_v17  ;;  %v256_v48 = vmul.f32 %v621_v12, %v255_v34  ;;  %p679_p6 = pneg %p678_p5 }
  0x34   : > { %v235_v35 = vrot.slane %v234_v25, 2  ;;  %v228_v41 = vrot.slane %v227_v24, 2 }
  0x35   : > { %v271_v22 = vld.sshfl [vmem:[#allocation1] sm:$0xff pattern:$0x75316420]  ;;  %v272_v23 = vld.sshfl [vmem:[#allocation1 + $0x8] sm:$0xff pattern:$0x75316420]  ;;  %v257_v58 = vadd.f32 %v621_v12, %v256_v48  ;;  %p684_p11 = pnand %p683_p10, %p679_p6 }
  0x36   : > { %v279_v30 = vsel %vm224_vm0, %v271_v22, 0.0  ;;  %v286_v31 = vsel %vm224_vm0, %v272_v23, 0.0  ;;  %v249_v36 = vrot.slane %v248_v27, 2  ;;  %v236_v42 = vadd.f32 %v235_v35, %v234_v25 }
  0x37   : > { %v273_v28 = vld.sshfl [vmem:[#allocation1 + $0x10] sm:$0xff pattern:$0x75316420]  ;;  %v274_v29 = vld.sshfl [vmem:[#allocation1 + $0x18] sm:$0xff pattern:$0x75316420]  ;;  %v229_v52 = vadd.f32 %v228_v41, %v227_v24  ;;  %v259_v5 = vsel %vm258_vm1, %v621_v12, %v257_v58 }
  0x38   : > { %v293_v32 = vsel %vm224_vm0, %v273_v28, 0.0  ;;  %v300_v33 = vsel %vm224_vm0, %v274_v29, 0.0  ;;  %v280_v37 = vrot.slane %v279_v30, 4  ;;  %v287_v38 = vrot.slane %v286_v31, 4 }
  0x39   : > { %v294_v39 = vrot.slane %v293_v32, 4  ;;  %v301_v40 = vrot.slane %v300_v33, 4  ;;  %v242_v43 = vrot.slane %v241_v26, 2  ;;  %v250_v49 = vadd.f32 %v249_v36, %v248_v27 }
  0x3a   : > { %v281_v44 = vadd.f32 %v280_v37, %v279_v30  ;;  %v288_v45 = vadd.f32 %v287_v38, %v286_v31  ;;  %v237_v54 = vrot.slane %v236_v42, 1  ;;  %v230_v61 = vrot.slane %v229_v52, 1 }
  0x3b   : > { %v295_v46 = vadd.f32 %v294_v39, %v293_v32  ;;  %v302_v47 = vadd.f32 %v301_v40, %v300_v33  ;;  %v243_v55 = vadd.f32 %v242_v43, %v241_v26  ;;  %v251_v59 = vrot.slane %v250_v49, 1 }
  0x3c   : > { %v289_v50 = vrot.slane %v288_v45, 2  ;;  %v282_v53 = vrot.slane %v281_v44, 2  ;;  %v238_v63 = vadd.f32 %v237_v54, %v236_v42  ;;  %v231_v8 = vadd.f32 %v230_v61, %v229_v52 }
  0x3d   : > { %v303_v51 = vrot.slane %v302_v47, 2  ;;  %v296_v57 = vrot.slane %v295_v46, 2  ;;  %v244_v0 = vrot.slane %v243_v55, 1  ;;  %v252_v6 = vadd.f32 %v251_v59, %v250_v49 }
  0x3e   : > { %v290_v56 = vadd.f32 %v289_v50, %v288_v45  ;;  %v283_v62 = vadd.f32 %v282_v53, %v281_v44  ;;  %v907_v11 = vmul.f32 %v259_v5, %v238_v63  ;;  %v911_v17 = vmul.f32 %v259_v5, %v231_v8 }
  0x3f   : > { %v304_v60 = vadd.f32 %v303_v51, %v302_v47  ;;  %v297_v2 = vadd.f32 %v296_v57, %v295_v46  ;;  %v245_v10 = vadd.f32 %v244_v0, %v243_v55  ;;  %v909_v15 = vmul.f32 %v259_v5, %v252_v6 }
  0x40   : > { %v291_v1 = vrot.slane %v290_v56, 1  ;;  %v284_v9 = vrot.slane %v283_v62, 1  ;;  %v312_v12 = vmul.f32 %v907_v11, %v907_v11  ;;  %v311_v25 = vmul.f32 %v911_v17, %v911_v17 }
  0x41   : > { %v305_v7 = vrot.slane %v304_v60, 1  ;;  %v298_v14 = vrot.slane %v297_v2, 1  ;;  %v913_v19 = vmul.f32 %v259_v5, %v245_v10  ;;  %v314_v23 = vmul.f32 %v909_v15, %v909_v15 }
  0x42   : > { %v292_v13 = vadd.f32 %v291_v1, %v290_v56  ;;  %v285_v18 = vadd.f32 %v284_v9, %v283_v62  ;;  %v383_v9 = vrot.slane %v909_v15, 4 }
  0x43   : > { %v306_v16 = vadd.f32 %v305_v7, %v304_v60  ;;  %v299_v20 = vadd.f32 %v298_v14, %v297_v2  ;;  %v313_v27 = vmul.f32 %v913_v19, %v913_v19 }
  0x44   : > { %v308_v21 = vmul.f32 %v292_v13, %v259_v5  ;;  %v307_v24 = vmul.f32 %v285_v18, %v259_v5  ;;  %v762_v18 = vmov 839922192  }
  0x45   : > { %v310_v22 = vmul.f32 %v306_v16, %v259_v5  ;;  %v309_v26 = vmul.f32 %v299_v20, %v259_v5  ;;  %v382_v5 = vrot.slane %v907_v11, 4  ;;  %v407_v20 = vunpack.c.l.s4 %v762_v18 }
  0x46   : > { %v316_v28 = vsub.f32 %v308_v21, %v312_v12  ;;  %v315_v30 = vsub.f32 %v307_v24, %v311_v25  ;;  %v385_v12 = vsel %vm224_vm0, %v913_v19, %v383_v9 }
  0x47   : > { %v318_v29 = vsub.f32 %v310_v22, %v314_v23  ;;  %v317_v31 = vsub.f32 %v309_v26, %v313_v27  ;;  %v384_v21 = vsel %vm224_vm0, %v911_v17, %v382_v5  ;;  %v408_v25 = vunpack.c.0.s8 %v407_v20 }
  0x48   : > { %v320_v32 = vmax.f32 %v316_v28, 0.0  ;;  %v319_v34 = vmax.f32 %v315_v30, 0.0  ;;  %v388_v26 = vsub.f32 %v889_v3, %v384_v21  ;;  %v389_v27 = vsub.f32 %v891_v4, %v385_v12 }
  0x49   : > { %v322_v33 = vmax.f32 %v318_v29, 0.0  ;;  %v321_v35 = vmax.f32 %v317_v31, 0.0 }
  0x4a   : > { %v324_v36 = vadd.f32 1e-06, %v320_v32  ;;  %v323_v38 = vadd.f32 1e-06, %v319_v34 }
  0x4b   : > { %v326_v37 = vadd.f32 1e-06, %v322_v33  ;;  %v325_v39 = vadd.f32 1e-06, %v321_v35 }
  0x4c   : > { %622 = vrsqrt.f32 %v324_v36  ;;  %vm343_vm2 = vweird.f32 %v324_v36  ;;  %vm333_vm6 = vweird.f32 %v323_v38 }
  0x4d   : > { %624 = vrsqrt.f32 %v326_v37  ;;  %vm363_vm4 = vweird.f32 %v326_v37  ;;  %vm353_vm9 = vweird.f32 %v325_v39 }
  0x4e   : > { %626 = vrsqrt.f32 %v323_v38 }
  0x4f   : > { %628 = vrsqrt.f32 %v325_v39 }
  0x52   : > { %v623_v40 = vpop.eup %622 }
  0x53   : > { %v625_v41 = vpop.eup %624  ;;  %v338_v44 = vmul.f32 %v623_v40, %v324_v36  ;;  %vm344_vm3 = vweird.f32 %v623_v40 }
  0x54   : > { %v627_v42 = vpop.eup %626  ;;  %v358_v45 = vmul.f32 %v625_v41, %v326_v37  ;;  %vm364_vm5 = vweird.f32 %v625_v41  ;;  %vm923_vm8 = vmor %vm343_vm2, %vm344_vm3 }
  0x55   : > { %v629_v43 = vpop.eup %628  ;;  %v328_v46 = vmul.f32 %v627_v42, %v323_v38  ;;  %v339_v48 = vmul.f32 %v623_v40, %v338_v44  ;;  %vm334_vm7 = vweird.f32 %v627_v42  ;;  %vm927_vm11 = vmor %vm363_vm4, %vm364_vm5 }
  0x56   : > { %v348_v47 = vmul.f32 %v629_v43, %v325_v39  ;;  %v359_v49 = vmul.f32 %v625_v41, %v358_v45  ;;  %vm354_vm10 = vweird.f32 %v629_v43  ;;  %vm931_vm12 = vmor %vm333_vm6, %vm334_vm7 }
  0x57   : > { %v329_v50 = vmul.f32 %v627_v42, %v328_v46  ;;  %v340_v52 = vmul.f32 0.5, %v339_v48  ;;  %vm940_vm13 = vmor %vm353_vm9, %vm354_vm10 }
  0x58   : > { %v349_v51 = vmul.f32 %v629_v43, %v348_v47  ;;  %v360_v53 = vmul.f32 0.5, %v359_v49 }
  0x59   : > { %v330_v54 = vmul.f32 0.5, %v329_v50  ;;  %v341_v56 = vsub.f32 1.5, %v340_v52 }
  0x5a   : > { %v350_v55 = vmul.f32 0.5, %v349_v51  ;;  %v361_v57 = vsub.f32 1.5, %v360_v53 }
  0x5b   : > { %v331_v58 = vsub.f32 1.5, %v330_v54  ;;  %v342_v60 = vmul.f32 %v623_v40, %v341_v56 }
  0x5c   : > { %v351_v59 = vsub.f32 1.5, %v350_v55  ;;  %v362_v62 = vmul.f32 %v625_v41, %v361_v57 }
  0x5d   : > { %v332_v0 = vmul.f32 %v627_v42, %v331_v58  ;;  %v346_v6 = vsel %vm923_vm8, %v623_v40, %v342_v60 }
  0x5e   : > { %v352_v2 = vmul.f32 %v629_v43, %v351_v59  ;;  %v366_v8 = vsel %vm927_vm11, %v625_v41, %v362_v62 }
  0x5f   : > { %v336_v13 = vsel %vm931_vm12, %v627_v42, %v332_v0 }
  0x60   : > { %v356_v11 = vsel %vm940_vm13, %v629_v43, %v352_v2 }
  0x99   : > { %v372_v10 = vpop.permute.xlu0 %371 }
  0x9a   : > { %v375_v14 = vmul.f32 %v372_v10, %v346_v6  ;;  %v377_v16 = vmul.f32 %v372_v10, %v366_v8  ;;  %v374_v23 = vmul.f32 %v372_v10, %v336_v13  ;;  %v376_v24 = vmul.f32 %v372_v10, %v356_v11 }
  0x9c   : > { %v394_v15 = vrot.slane %v375_v14, 4  ;;  %v395_v22 = vrot.slane %v377_v16, 4 }
  0x9e   : > { %v396_v28 = vsel %vm224_vm0, %v374_v23, %v394_v15  ;;  %v397_v29 = vsel %vm224_vm0, %v376_v24, %v395_v22 }
  0x9f   : > { %v400_v19 = vmul.f32 %v396_v28, %v388_v26  ;;  %v401_v30 = vmul.f32 %v397_v29, %v389_v27 }
  0xa1   : > { %v405_v17 = vpop.permute.xlu0 %404 }
  0xa2   : > { %v409_v31 = vperm.slane %v405_v17, %v408_v25 }
  0xa4   : > { %v411_v3 = vadd.f32 %v409_v31, %v400_v19  ;;  %v412_v4 = vadd.f32 %v409_v31, %v401_v30 }
  0xa6   : > { %413 = vst [vmem:[%s206_s30] sm:$0xff] %v411_v3 }
  0xa7   : > { %414 = vst [vmem:[%s206_s30 + $0x8] sm:$0xff] %v412_v4 }
  0xa8   : > { %687 = shalt.err (!%p684_p11)
}
  0xa9   : > { %540 = dma.vmem_to_hbm [thread:$0]  (%p848_p9), %s432_s24, 256, %s434_s8, %s416_s9  }
  0xaa PF: > { %p551_p13 = scmp.ge.s32.totalorder %s758_s19, 2  ;;  %s445_s7 = sand.u32 1, %s730_s12  }
  0xab   : > { %s446_s21 = scalar_lea.sflag [#allocation4], %s445_s7 }
  0xac   : > { %p547_p0 = pnand %p551_p13, %p854_p12 }
  0xae   : > { %p548_p1 = pneg %p547_p0 }
  0xb0   : > { %725 = dma.done.wait (%p548_p1), %s446_s21, 256  }
  0xb1   : > { %727 = vsyncadd (%p548_p1), %s446_s21, 4294967040  ;;  %s19_s19 = sadd.s32 1, %s758_s19   ;;  %s1021_s28 = sld [smem:[#allocation8_spill]] }
  0xb2   : > { %p16_p2 = scmp.ge.s32.totalorder %s19_s19, 6   ;;  %s1022_s12 = smov %s734_s13 }
  0xb3   : > { %s1023_s13 = smov %s738_s14  ;;  %s1024_s14 = smov %s861_s6 }
  0xb4   : > { %s1025_s15 = smov %s750_s17  ;;  %s1026_s16 = smov %s754_s18 }
  0xb5   : > { %s1027_s17 = smov %s1030_s22  ;;  %18 = sbr.rel (!%p16_p2) target bundleno = 7 (0x7), region = 79 }
  0xb7   : > { %s1028_s18 = smov %s1021_s28 }
  0xba   :  { %452 = vsyncpa [#allocation3], 1 }
  0xbb   :  { %454 = vsyncpa [#allocation3 + $0x1], 1 }
  0xbc   :  { %455 = vsyncpa [#allocation4], 1 }
  0xbd   :  { %457 = vsyncpa [#allocation4 + $0x1], 1 }

</bundles_post_ra>
